<compile_context>
chip_gen: v7x
topology: tpu7x:2x2x1
jax: 0.10.0
libtpu: 0.0.40
codegen_flags: <defaults>
</compile_context>

<pallas_src>
import math

import jax
import jax.numpy as jnp
from jax.experimental import pallas as pl
from jax.experimental.pallas import tpu as pltpu


_GELU_C = math.sqrt(2.0 / math.pi)


def _gelu_new(x):
    # GPT-2 "gelu_new" (tanh approximation); tanh lowers to the EUP slot.
    return 0.5 * x * (1.0 + jnp.tanh(_GELU_C * (x + 0.044715 * x * x * x)))


# ----------------------------- kernels ------------------------------------- #
# grid = (M_pad // tile_m, I_pad // tile_i)
#   axis 0: independent row tiles ("parallel", shards across v7x TensorCores)
#   axis 1: intermediate-dim reduction of the second matmul ("arbitrary")


def _mlp_kernel_f32_out(x_ref, w1_ref, b1_ref, w2_ref, b2_ref, out_ref):
    """f32 output: accumulate directly into the output block (resident over axis 1)."""
    i = pl.program_id(1)

    @pl.when(i == 0)
    def _():
        # Initialize the accumulator with the output bias (saves a final pass).
        out_ref[...] = jnp.broadcast_to(b2_ref[...], out_ref.shape)

    # h = gelu_new(x @ W1[:, i_blk] + b1[i_blk])          (tile_m, tile_i), f32
    h = jnp.dot(x_ref[...], w1_ref[...], preferred_element_type=jnp.float32)
    h = _gelu_new(h + b1_ref[pl.ds(i, 1), :])

    # out += h @ W2[i_blk, :]                              (tile_m, H), f32
    out_ref[...] += jnp.dot(h.astype(w2_ref.dtype), w2_ref[...],
                            preferred_element_type=jnp.float32)


def _mlp_kernel_cast_out(x_ref, w1_ref, b1_ref, w2_ref, b2_ref, out_ref, acc_ref):
    """Non-f32 output: accumulate in an f32 VMEM scratch, cast on the final store."""
    i = pl.program_id(1)

    @pl.when(i == 0)
    def _():
        acc_ref[...] = jnp.broadcast_to(b2_ref[...], acc_ref.shape)

    h = jnp.dot(x_ref[...], w1_ref[...], preferred_element_type=jnp.float32)
    h = _gelu_new(h + b1_ref[pl.ds(i, 1), :])
    acc_ref[...] += jnp.dot(h.astype(w2_ref.dtype), w2_ref[...],
                            preferred_element_type=jnp.float32)

    @pl.when(i == pl.num_programs(1) - 1)
    def _():
        out_ref[...] = acc_ref[...].astype(out_ref.dtype)


# --------------------------- tile / VMEM planning --------------------------- #


def _round_up(x, m):
    return ((x + m - 1) // m) * m


def _shrink_tile(t):
    # Halve but stay a multiple of 128 (and >= 128).
    return max(128, ((t // 2) // 128) * 128)


def _tpu_generation():
    try:
        kind = jax.devices()[0].device_kind.lower()
    except Exception:
        return "unknown"
    if "v5 lite" in kind or "v5e" in kind or "v5lite" in kind:
        return "v5e"
    if "v6" in kind:
        return "v6e"
    if "v7" in kind or "7x" in kind:
        return "v7x"
    return "unknown"


def _footprint_bytes(tile_m, tile_i, H, I_pad, cdt_size, out_size, use_scratch):
    """Per-step VMEM footprint (double-buffered blocks + resident biases + scratch)."""
    x_blk = 2 * tile_m * H * cdt_size
    w1_blk = 2 * H * tile_i * cdt_size
    w2_blk = 2 * tile_i * H * cdt_size
    out_blk = 2 * tile_m * H * out_size
    acc = tile_m * H * 4 if use_scratch else 0
    b1 = 2 * I_pad * 4
    b2 = 2 * H * 4
    return x_blk + w1_blk + w2_blk + out_blk + acc + b1 + b2


def _choose_config(M, H, I, gen, cdt_size, out_size, use_scratch, tile_m, tile_i):
    # Per-generation preferred tiles and a conservative cap on scoped VMEM
    # (v5e/v6e: 128 MiB physical, v7x: 64 MiB per TensorCore).
    if gen == "v6e":
        pref_m, pref_i, vmem_cap = 512, 512, 100 << 20
    elif gen == "v7x":
        pref_m, pref_i, vmem_cap = 256, 512, 56 << 20
    elif gen == "v5e":
        pref_m, pref_i, vmem_cap = 256, 512, 100 << 20
    else:
        pref_m, pref_i, vmem_cap = 256, 512, 64 << 20

    if tile_m is None:
        tile_m = min(pref_m, _round_up(max(M, 1), 128))
    if tile_i is None:
        tile_i = min(pref_i, _round_up(max(I, 1), 128))
    assert tile_m % 128 == 0, "tile_m must be a multiple of 128"
    assert tile_i % 128 == 0, "tile_i must be a multiple of 128"

    # Shrink tiles until the double-buffered footprint fits the VMEM budget.
    budget = max(vmem_cap - (4 << 20), 8 << 20)
    while _footprint_bytes(tile_m, tile_i, H, _round_up(I, tile_i),
                           cdt_size, out_size, use_scratch) > budget:
        if tile_i > 128:
            tile_i = _shrink_tile(tile_i)
        elif tile_m > 128:
            tile_m = _shrink_tile(tile_m)
        else:
            break

    # v7x: the "parallel" row axis is what shards work across the two TensorCores;
    # make sure there are at least two row tiles whenever possible.
    if gen == "v7x":
        while tile_m > 128 and _round_up(M, tile_m) // tile_m < 2:
            tile_m = _shrink_tile(tile_m)

    fp = _footprint_bytes(tile_m, tile_i, H, _round_up(I, tile_i),
                          cdt_size, out_size, use_scratch)
    vmem_limit = int(min(vmem_cap, max(16 << 20, int(fp * 1.3) + (2 << 20))))
    return tile_m, tile_i, vmem_limit


# ------------------------------ wrapper ------------------------------------- #


def re_gpt_mlp(hidden_states, w_fc, b_fc, w_proj, b_proj, *,
               compute_dtype=jnp.bfloat16, tile_m=None, tile_i=None):
    """Re_gptMLP forward.

    Weight layout is (in, out), i.e. the transpose of torch nn.Linear.weight, so the
    math is x @ w_fc + b_fc -> gelu_new -> @ w_proj + b_proj (dropout = identity).
    Matmul operands are cast to `compute_dtype` (bf16 by default for MXU throughput);
    accumulation, GELU and biases stay in float32; the output keeps the input dtype.
    """
    orig_shape = hidden_states.shape
    H = orig_shape[-1]
    I = w_fc.shape[1]
    assert w_fc.shape == (H, I)
    assert b_fc.shape == (I,)
    assert w_proj.shape == (I, H)
    assert b_proj.shape == (H,)

    out_dtype = hidden_states.dtype
    out_is_f32 = out_dtype == jnp.float32
    cdt = jnp.dtype(compute_dtype)
    out_size = jnp.dtype(out_dtype).itemsize

    x = hidden_states.reshape(-1, H).astype(cdt)
    M = x.shape[0]

    gen = _tpu_generation()
    tile_m, tile_i, vmem_limit = _choose_config(
        M, H, I, gen, cdt.itemsize, out_size,
        use_scratch=not out_is_f32, tile_m=tile_m, tile_i=tile_i)

    M_pad = _round_up(M, tile_m)
    I_pad = _round_up(I, tile_i)
    grid_m = M_pad // tile_m
    grid_i = I_pad // tile_i

    # Zero-pad rows (M) and the intermediate dim (I). Padded rows are discarded;
    # padded intermediate columns contribute 0 (W_proj pad rows are zero).
    if M_pad != M:
        x = jnp.pad(x, ((0, M_pad - M), (0, 0)))

    w1 = w_fc.astype(cdt)
    w2 = w_proj.astype(cdt)
    b1 = b_fc.astype(jnp.float32)
    if I_pad != I:
        w1 = jnp.pad(w1, ((0, 0), (0, I_pad - I)))
        w2 = jnp.pad(w2, ((0, I_pad - I), (0, 0)))
        b1 = jnp.pad(b1, (0, I_pad - I))
    b1 = b1.reshape(grid_i, tile_i)                       # resident, sliced in-kernel
    b2 = b_proj.astype(jnp.float32).reshape(1, H)

    kernel = _mlp_kernel_f32_out if out_is_f32 else _mlp_kernel_cast_out
    scratch = [] if out_is_f32 else [pltpu.VMEM((tile_m, H), jnp.float32)]

    cost = pl.CostEstimate(
        flops=4 * M_pad * H * I_pad,
        transcendentals=M_pad * I_pad,
        bytes_accessed=int(M_pad * H * cdt.itemsize                 # x
                           + grid_m * 2 * H * I_pad * cdt.itemsize  # weights / row tile
                           + M_pad * H * out_size                   # out
                           + (I_pad + H) * 4),                      # biases
    )

    out = pl.pallas_call(
        kernel,
        out_shape=jax.ShapeDtypeStruct((M_pad, H), out_dtype),
        grid_spec=pltpu.PrefetchScalarGridSpec(
            num_scalar_prefetch=0,
            grid=(grid_m, grid_i),
            in_specs=[
                pl.BlockSpec((tile_m, H), lambda m, i: (m, 0)),       # x rows
                pl.BlockSpec((H, tile_i), lambda m, i: (0, i)),       # W_fc block
                pl.BlockSpec((grid_i, tile_i), lambda m, i: (0, 0)),  # b_fc (resident)
                pl.BlockSpec((tile_i, H), lambda m, i: (i, 0)),       # W_proj block
                pl.BlockSpec((1, H), lambda m, i: (0, 0)),            # b_proj (resident)
            ],
            out_specs=pl.BlockSpec((tile_m, H), lambda m, i: (m, 0)),
            scratch_shapes=scratch,
        ),
        compiler_params=pltpu.CompilerParams(
            dimension_semantics=("parallel", "arbitrary"),
            vmem_limit_bytes=vmem_limit,
        ),
        cost_estimate=cost,
    )(x, w1, b1, w2, b2)

    if M_pad != M:
        out = out[:M]
    return out.reshape(orig_shape)


def _reference(x, w_fc, b_fc, w_proj, b_proj):
    h = jnp.dot(x, w_fc) + b_fc
    h = 0.5 * h * (1.0 + jnp.tanh(_GELU_C * (h + 0.044715 * h ** 3)))
    return jnp.dot(h, w_proj) + b_proj


if __name__ == "__main__":
    key = jax.random.PRNGKey(0)
    batch, seq, hidden, intermediate = 2, 8, 32, 256
    k1, k2, k3, k4, k5 = jax.random.split(key, 5)

    x = jax.random.normal(k1, (batch, seq, hidden), dtype=jnp.float32)
    w_fc = jax.random.normal(k2, (hidden, intermediate), dtype=jnp.float32) * 0.02
    b_fc = jax.random.normal(k3, (intermediate,), dtype=jnp.float32) * 0.02
    w_proj = jax.random.normal(k4, (intermediate, hidden), dtype=jnp.float32) * 0.02
    b_proj = jax.random.normal(k5, (hidden,), dtype=jnp.float32) * 0.02

    ref = _reference(x, w_fc, b_fc, w_proj, b_proj)

    # 1) f32-compute path; tile_i=128 -> two reduction steps, exercising the resident
    #    bias dynamic slice and the accumulate-into-output pattern.
    out_f32 = re_gpt_mlp(x, w_fc, b_fc, w_proj, b_proj,
                         compute_dtype=jnp.float32, tile_i=128)
    out_f32 = jax.block_until_ready(out_f32)
    assert out_f32.shape == x.shape and out_f32.dtype == jnp.float32
    assert jnp.allclose(out_f32, ref, atol=1e-4, rtol=1e-3)

    # 2) default bf16-MXU compute path (f32 I/O, f32 accumulation).
    out_bf16c = jax.block_until_ready(re_gpt_mlp(x, w_fc, b_fc, w_proj, b_proj))
    assert out_bf16c.shape == x.shape and out_bf16c.dtype == jnp.float32
    assert jnp.allclose(out_bf16c, ref, atol=5e-3, rtol=5e-2)

    # 3) bf16 I/O (scratch-accumulator path) with ragged M and I to exercise padding.
    xb = jax.random.normal(k1, (3, 5, hidden), dtype=jnp.bfloat16)
    wf = w_fc[:, :200].astype(jnp.bfloat16)
    bf = b_fc[:200].astype(jnp.bfloat16)
    wp = w_proj[:200, :].astype(jnp.bfloat16)
    bp = b_proj.astype(jnp.bfloat16)
    out_b = jax.block_until_ready(re_gpt_mlp(xb, wf, bf, wp, bp))
    ref_b = _reference(xb.astype(jnp.float32), wf.astype(jnp.float32),
                       bf.astype(jnp.float32), wp.astype(jnp.float32),
                       bp.astype(jnp.float32))
    assert out_b.shape == xb.shape and out_b.dtype == jnp.bfloat16
    assert jnp.allclose(out_b.astype(jnp.float32), ref_b, atol=1e-2, rtol=1e-1)

    print("KERNEL_OK")
</pallas_src>

<mosaic_0001>
module attributes {stable_mosaic.version = 11 : i64} {
  func.func @_mlp_kernel_f32_out(%arg0: i32, %arg1: i32, %arg2: memref<128x32xf32, #tpu.memory_space<vmem>>, %arg3: memref<32x128xf32, #tpu.memory_space<vmem>>, %arg4: memref<2x128xf32, #tpu.memory_space<vmem>>, %arg5: memref<128x32xf32, #tpu.memory_space<vmem>>, %arg6: memref<1x32xf32, #tpu.memory_space<vmem>>, %arg7: memref<128x32xf32, #tpu.memory_space<vmem>>) attributes {dimension_semantics = [#tpu.dimension_semantics<parallel>, #tpu.dimension_semantics<arbitrary>], iteration_bounds = array<i64: 1, 2>, scalar_prefetch = 0 : i64, scratch_operands = 0 : i64, tpu.core_type = #tpu.core_type<tc>, window_params = [{transform_indices = @transform_0, window_bounds = array<i64: 128, 32>}, {transform_indices = @transform_1, window_bounds = array<i64: 32, 128>}, {pipeline_mode = #tpu.pipeline_mode<synchronous>, transform_indices = @transform_2, window_bounds = array<i64: 2, 128>}, {transform_indices = @transform_3, window_bounds = array<i64: 128, 32>}, {pipeline_mode = #tpu.pipeline_mode<synchronous>, transform_indices = @transform_4, window_bounds = array<i64: 1, 32>}, {transform_indices = @transform_5, window_bounds = array<i64: 128, 32>}]} {
    %c0_i32 = arith.constant 0 : i32
    %0 = arith.cmpi eq, %arg1, %c0_i32 : i32
    %1 = arith.extui %0 : i1 to i32
    %c0_i32_0 = arith.constant 0 : i32
    %2 = arith.cmpi ne, %1, %c0_i32_0 : i32
    scf.if %2 {
      %c0_16 = arith.constant 0 : index
      %c0_17 = arith.constant 0 : index
      %28 = vector.load %arg6[%c0_16, %c0_17] : memref<1x32xf32, #tpu.memory_space<vmem>>, vector<1x32xf32>
      %29 = vector.shape_cast %28 : vector<1x32xf32> to vector<1x32xf32>
      %30 = vector.broadcast %29 : vector<1x32xf32> to vector<128x32xf32>
      %c0_18 = arith.constant 0 : index
      %c0_19 = arith.constant 0 : index
      %31 = vector.load %arg7[%c0_18, %c0_19] : memref<128x32xf32, #tpu.memory_space<vmem>>, vector<128x32xf32>
      tpu.vector_store %arg7[%c0_18, %c0_19], %30 {strides = array<i32>} : memref<128x32xf32, #tpu.memory_space<vmem>>, vector<128x32xf32>,
    } else {
    }
    %c0 = arith.constant 0 : index
    %c0_1 = arith.constant 0 : index
    %3 = vector.load %arg2[%c0, %c0_1] : memref<128x32xf32, #tpu.memory_space<vmem>>, vector<128x32xf32>
    %c0_2 = arith.constant 0 : index
    %c0_3 = arith.constant 0 : index
    %4 = vector.load %arg3[%c0_2, %c0_3] : memref<32x128xf32, #tpu.memory_space<vmem>>, vector<32x128xf32>
    %cst = arith.constant dense<0.000000e+00> : vector<128x128xf32>
    %5 = tpu.matmul %3, %4, %cst {dimension_numbers = #tpu.dot_dimension_numbers<[1], [0], [0], [1], [0, 0, 1, 1], [], []>} : vector<128x32xf32>, vector<32x128xf32>, vector<128x128xf32> -> vector<128x128xf32>
    %6 = arith.index_cast %arg1 : i32 to index
    %c0_4 = arith.constant 0 : index
    %7 = vector.load %arg4[%6, %c0_4] : memref<2x128xf32, #tpu.memory_space<vmem>>, vector<1x128xf32>
    %8 = vector.broadcast %7 : vector<1x128xf32> to vector<128x128xf32>
    %9 = arith.addf %5, %8 : vector<128x128xf32>
    %cst_5 = arith.constant 5.000000e-01 : f32
    %10 = vector.broadcast %cst_5 : f32 to vector<128x128xf32>
    %11 = arith.mulf %10, %9 : vector<128x128xf32>
    %cst_6 = arith.constant 4.471500e-02 : f32
    %12 = vector.broadcast %cst_6 : f32 to vector<128x128xf32>
    %13 = arith.mulf %12, %9 : vector<128x128xf32>
    %14 = arith.mulf %13, %9 : vector<128x128xf32>
    %15 = arith.mulf %14, %9 : vector<128x128xf32>
    %16 = arith.addf %9, %15 : vector<128x128xf32>
    %cst_7 = arith.constant 0.797884583 : f32
    %17 = vector.broadcast %cst_7 : f32 to vector<128x128xf32>
    %18 = arith.mulf %17, %16 : vector<128x128xf32>
    %19 = math.tanh %18 : vector<128x128xf32>
    %cst_8 = arith.constant 1.000000e+00 : f32
    %20 = vector.broadcast %cst_8 : f32 to vector<128x128xf32>
    %21 = arith.addf %20, %19 : vector<128x128xf32>
    %22 = arith.mulf %11, %21 : vector<128x128xf32>
    %c0_9 = arith.constant 0 : index
    %c0_10 = arith.constant 0 : index
    %23 = vector.load %arg7[%c0_9, %c0_10] : memref<128x32xf32, #tpu.memory_space<vmem>>, vector<128x32xf32>
    %c0_11 = arith.constant 0 : index
    %c0_12 = arith.constant 0 : index
    %24 = vector.load %arg5[%c0_11, %c0_12] : memref<128x32xf32, #tpu.memory_space<vmem>>, vector<128x32xf32>
    %cst_13 = arith.constant dense<0.000000e+00> : vector<128x32xf32>
    %25 = tpu.matmul %22, %24, %cst_13 {dimension_numbers = #tpu.dot_dimension_numbers<[1], [0], [0], [1], [0, 0, 1, 1], [], []>} : vector<128x128xf32>, vector<128x32xf32>, vector<128x32xf32> -> vector<128x32xf32>
    %26 = arith.addf %23, %25 : vector<128x32xf32>
    %c0_14 = arith.constant 0 : index
    %c0_15 = arith.constant 0 : index
    %27 = vector.load %arg7[%c0_14, %c0_15] : memref<128x32xf32, #tpu.memory_space<vmem>>, vector<128x32xf32>
    tpu.vector_store %arg7[%c0_14, %c0_15], %26 {strides = array<i32>} : memref<128x32xf32, #tpu.memory_space<vmem>>, vector<128x32xf32>,
    return
  }
  func.func @transform_0(%arg0: i32, %arg1: i32) -> (i32, i32) {
    %c0_i32 = arith.constant 0 : i32
    %c0_i32_0 = arith.constant 0 : i32
    return %arg0, %c0_i32 : i32, i32
  }
  func.func @transform_1(%arg0: i32, %arg1: i32) -> (i32, i32) {
    %c0_i32 = arith.constant 0 : i32
    %c0_i32_0 = arith.constant 0 : i32
    return %c0_i32, %arg1 : i32, i32
  }
  func.func @transform_2(%arg0: i32, %arg1: i32) -> (i32, i32) {
    %c0_i32 = arith.constant 0 : i32
    %c0_i32_0 = arith.constant 0 : i32
    %c0_i32_1 = arith.constant 0 : i32
    return %c0_i32, %c0_i32_0 : i32, i32
  }
  func.func @transform_3(%arg0: i32, %arg1: i32) -> (i32, i32) {
    %c0_i32 = arith.constant 0 : i32
    %c0_i32_0 = arith.constant 0 : i32
    return %arg1, %c0_i32 : i32, i32
  }
  func.func @transform_4(%arg0: i32, %arg1: i32) -> (i32, i32) {
    %c0_i32 = arith.constant 0 : i32
    %c0_i32_0 = arith.constant 0 : i32
    %c0_i32_1 = arith.constant 0 : i32
    return %c0_i32, %c0_i32_0 : i32, i32
  }
  func.func @transform_5(%arg0: i32, %arg1: i32) -> (i32, i32) {
    %c0_i32 = arith.constant 0 : i32
    %c0_i32_0 = arith.constant 0 : i32
    return %arg0, %c0_i32 : i32, i32
  }
}

</mosaic_0001>

<bundles_post_ra>
// kernel: tpu_custom_call.1
= control target key start
LH: loop header
LB: loop body
LE: loop exit
PB: predicated region body
PF: predicated region fallthrough
CT: control target
= control target key end

     0   :  { %s1396_s18 = smov 0   ;;  %s1398_s19 = smov 0   ;;  %s1843_s0 = inlined_call_operand.vmem [shape: f32[128,32], index: 0, kind: input, shape index: {}]   ;;  %s1844_s1 = inlined_call_operand.vmem [shape: f32[32,256], index: 1, kind: input, shape index: {}]   ;;  %s1845_s2 = inlined_call_operand.vmem [shape: f32[2,128], index: 2, kind: input, shape index: {}]   ;;  %s1846_s3 = inlined_call_operand.vmem [shape: f32[256,32], index: 3, kind: input, shape index: {}]   ;;  %s1847_s4 = inlined_call_operand.vmem [shape: f32[1,32], index: 4, kind: input, shape index: {}]   ;;  %s1848_s5 = inlined_call_operand.vmem [shape: f32[128,32], index: 5, kind: output, shape index: {}]  }
   0x1   :  { %s1400_s20 = smov 0   ;;  %s1402_s21 = smov 0  }
   0x2   :  { %s1404_s22 = smov 0  }
   0x3 LB: > { %s24_s23 = sadd.s32 1, %s1360_s21  ;;  %p67_p1 = scmp.ne.s32.totalorder %s1352_s19, %s1348_s18  ;;  %s1364_s22 = sphi %s1404_s22, %s15_s22   ;;  %s1360_s21 = sphi %s1402_s21, %s1852_s21   ;;  %s1356_s20 = sphi %s1400_s20, %s1851_s20   ;;  %s1352_s19 = sphi %s1398_s19, %s1850_s19   ;;  %s1348_s18 = sphi %s1396_s18, %s1849_s18  }
   0x4   : > { %p25_p0 = scmp.ge.s32.totalorder %s24_s23, 2  ;;  %p68_p2 = scmp.eq.s32.totalorder %s1364_s22, 0 }
   0x5   : > { %s60_s25 = sadd.s32 1, %s1352_s19  ;;  %p1028_p5 = scmp.ge.s32.totalorder %s1364_s22, 2 }
   0x6   : > { %s1854_s23 = smov (%p25_p0, %s24_s23), 0  ;;  %p69_p3 = por %p68_p2, %p67_p1 }
   0x7   : > { %s57_s24 = ssub.s32 %s1360_s21, %s1854_s23  ;;  %202 = sbr.rel (%p1028_p5) target bundleno = 21 (0x15), region = 28 }
   0x8   : > { %p58_p4 = scmp.eq.s32.totalorder %s57_s24, 0 }
   0xa   : > { %s1431_s26 = scalar_select %p58_p4, %s1352_s19, %s60_s25  }
   0xe   : > { %205 = sbr.rel (!%p69_p3) target bundleno = 21 (0x15), region = 32  ;;  %s207_s27 = sand.u32 (%p69_p3), 1, %s1352_s19  }
   0xf   : > { %s1030_s28 = sshll.u32 (%p69_p3), %s1360_s21, 3  ;;  %s1029_s29 = sshll.u32 (%p69_p3), %s207_s27, 5 }
  0x10   : > { %s211_s7 = scalar_lea.vmem (%p69_p3), %s1844_s1, %s1030_s28  ;;  %s209_s8 = scalar_lea.vmem (%p69_p3), [#allocation2], %s1029_s29 }
  0x11   : > { %v245_v0 = vld [vmem:[%s211_s7] sm:$0xff] (%p69_p3)  ;;  %v247_v1 = vld [vmem:[%s211_s7 + $0x10] sm:$0xff] (%p69_p3) }
  0x12   : > { %v249_v2 = vld [vmem:[%s211_s7 + $0x20] sm:$0xff] (%p69_p3)  ;;  %246 = vst [vmem:[%s209_s8] sm:$0xff] (%p69_p3), %v245_v0  ;;  %248 = vst [vmem:[%s209_s8 + $0x8] sm:$0xff] (%p69_p3), %v247_v1  ;;  %v251_v3 = vld [vmem:[%s211_s7 + $0x30] sm:$0xff] (%p69_p3) }
  0x13   : > { %250 = vst [vmem:[%s209_s8 + $0x10] sm:$0xff] (%p69_p3), %v249_v2  ;;  %252 = vst [vmem:[%s209_s8 + $0x18] sm:$0xff] (%p69_p3), %v251_v3 }
  0x15 PF: > { %p1031_p6 = scmp.ge.s32.totalorder %s1364_s22, 1  ;;  %p266_p7 = scmp.lt.s32.totalorder %s1364_s22, 3 }
  0x17   : > { %p267_p8 = pnand %p1031_p6, %p266_p7 }
  0x18   : > { %s273_s9 = sand.u32 (!%p267_p8), 1, %s1348_s18   ;;  %s1033_s10 = sshll.u32 (!%p267_p8), %s1356_s20, 4 }
  0x19   : > { %270 = sbr.rel (%p267_p8) target bundleno = 541 (0x21d), region = 74  ;;  %s1032_s11 = sshll.u32 (!%p267_p8), %s273_s9, 5 }
  0x1a   : > { %p317_p9 = scmp.lt.s32.totalorder (!%p267_p8), %s1033_s10, 31  ;;  %s275_s16 = scalar_lea.vmem (!%p267_p8), [#allocation2], %s1032_s11 }
  0x1b   : > { %p1035_p10 = scmp.ne.s32.totalorder (!%p267_p8), %s1356_s20, 0 }
  0x20   : > { %s1856_s10 = smov (!%p317_p9, %s1033_s10), 31  ;;  %331 = sbr.rel (%p1035_p10) target bundleno = 42 (0x2a), region = 82 }
  0x21   : > { %s1034_s12 = sshll.u32 %s1856_s10, 3  ;;  %v1036_v4 = vld [vmem:[%s1847_s4] ss:$0 sm:$0xff] (!%p1035_p10)  ;;  %vm339_vm0 = vcmask (!%p1035_p10), 261120  }
  0x22   : > { %s1446_s15 = scalar_lea.vmem %s1846_s3, %s1034_s12  ;;  %340 = vst.msk [vmem:[%s1848_s5] sm:$0xff] (!%p1035_p10), %vm339_vm0, %v1036_v4  ;;  %341 = vst.msk [vmem:[%s1848_s5 + $0x8] sm:$0xff] (!%p1035_p10), %vm339_vm0, %v1036_v4 }
  0x23   : > { %342 = vst.msk [vmem:[%s1848_s5 + $0x10] sm:$0xff] (!%p1035_p10), %vm339_vm0, %v1036_v4  ;;  %343 = vst.msk [vmem:[%s1848_s5 + $0x18] sm:$0xff] (!%p1035_p10), %vm339_vm0, %v1036_v4 }
  0x24   : > { %344 = vst.msk [vmem:[%s1848_s5 + $0x20] sm:$0xff] (!%p1035_p10), %vm339_vm0, %v1036_v4  ;;  %345 = vst.msk [vmem:[%s1848_s5 + $0x28] sm:$0xff] (!%p1035_p10), %vm339_vm0, %v1036_v4 }
  0x25   : > { %346 = vst.msk [vmem:[%s1848_s5 + $0x30] sm:$0xff] (!%p1035_p10), %vm339_vm0, %v1036_v4  ;;  %347 = vst.msk [vmem:[%s1848_s5 + $0x38] sm:$0xff] (!%p1035_p10), %vm339_vm0, %v1036_v4 }
  0x26   : > { %348 = vst.msk [vmem:[%s1848_s5 + $0x40] sm:$0xff] (!%p1035_p10), %vm339_vm0, %v1036_v4  ;;  %349 = vst.msk [vmem:[%s1848_s5 + $0x48] sm:$0xff] (!%p1035_p10), %vm339_vm0, %v1036_v4 }
  0x27   : > { %350 = vst.msk [vmem:[%s1848_s5 + $0x50] sm:$0xff] %vm339_vm0, %v1036_v4  ;;  %351 = vst.msk [vmem:[%s1848_s5 + $0x58] sm:$0xff] %vm339_vm0, %v1036_v4 }
  0x28   : > { %352 = vst.msk [vmem:[%s1848_s5 + $0x60] sm:$0xff] %vm339_vm0, %v1036_v4  ;;  %353 = vst.msk [vmem:[%s1848_s5 + $0x68] sm:$0xff] %vm339_vm0, %v1036_v4 }
  0x29   : > { %354 = vst.msk [vmem:[%s1848_s5 + $0x70] sm:$0xff] %vm339_vm0, %v1036_v4  ;;  %355 = vst.msk [vmem:[%s1848_s5 + $0x78] sm:$0xff] %vm339_vm0, %v1036_v4 }
  0x2a PF: > { %v372_v5 = vld [vmem:[%s275_s16] sm:$0xff]  ;;  %v373_v6 = vld [vmem:[%s275_s16 + $0x8] sm:$0xff]  ;;  %v374_v7 = vld [vmem:[%s275_s16 + $0x10] sm:$0xff]  ;;  %vm382_vm1 = vcmask 261120   ;;  %s376_s13 = scalar_lea.vmem %s1845_s2, %s1356_s20 }
  0x2b   : > { %v1198_v8 = vpack.c.bf16 %v373_v6, %v372_v5  ;;  %v375_v9 = vld [vmem:[%s275_s16 + $0x18] sm:$0xff]  ;;  %v356_v10 = vld [vmem:[%s1843_s0] sm:$0xff]  ;;  %v737_v13 = vld [vmem:[%s1446_s15 + $0x8] sm:$0xff] }
  0x2c   : > { %v1202_v11 = vpack.c.bf16 %v375_v9, %v374_v7  ;;  %1118 = vmatprep.mubr.msk.f32.mxu0 %vm382_vm1, %v356_v10  ;;  %v736_v12 = vld [vmem:[%s1446_s15] sm:$0xff]  ;;  %v357_v14 = vld [vmem:[%s1843_s0 + $0x8] sm:$0xff]  ;;  %v358_v16 = vld [vmem:[%s1843_s0 + $0x10] sm:$0xff] }
  0x2d   : > { %1199 = vmatprep.subr.bf16.mxu0 %v1198_v8  ;;  %v1206_v15 = vpack.c.bf16 %v737_v13, %v736_v12  ;;  %v359_v17 = vld [vmem:[%s1843_s0 + $0x18] sm:$0xff]  ;;  %v360_v18 = vld [vmem:[%s1843_s0 + $0x20] sm:$0xff]  ;;  %v361_v19 = vld [vmem:[%s1843_s0 + $0x28] sm:$0xff] }
  0x2e   : > { %1201 = vmatpush3.bf16.msra.mxu0 %v1198_v8  ;;  %v362_v20 = vld [vmem:[%s1843_s0 + $0x30] sm:$0xff]  ;;  %v363_v21 = vld [vmem:[%s1843_s0 + $0x38] sm:$0xff]  ;;  %v364_v22 = vld [vmem:[%s1843_s0 + $0x40] sm:$0xff] }
  0x2f   : > { %1203 = vmatprep.subr.bf16.mxu0 %v1202_v11  ;;  %1238 = vmatprep.subr.bf16.mxu1 %v1206_v15  ;;  %v365_v23 = vld [vmem:[%s1843_s0 + $0x48] sm:$0xff]  ;;  %v366_v24 = vld [vmem:[%s1843_s0 + $0x50] sm:$0xff]  ;;  %v367_v25 = vld [vmem:[%s1843_s0 + $0x58] sm:$0xff] }
  0x30   : > { %1246 = vmatpush3.bf16.msra.mxu1 %v1206_v15  ;;  %v368_v26 = vld [vmem:[%s1843_s0 + $0x60] sm:$0xff]  ;;  %v369_v27 = vld [vmem:[%s1843_s0 + $0x68] sm:$0xff]  ;;  %v370_v28 = vld [vmem:[%s1843_s0 + $0x70] sm:$0xff] }
  0x31   : > { %v371_v29 = vld [vmem:[%s1843_s0 + $0x78] sm:$0xff]  ;;  %v738_v30 = vld [vmem:[%s1446_s15 + $0x10] sm:$0xff]  ;;  %v740_v33 = vld [vmem:[%s1446_s15 + $0x20] sm:$0xff] }
  0x32   : > { %1205 = vmatpush3.bf16.msra.mxu0 %v1202_v11  ;;  %v739_v31 = vld [vmem:[%s1446_s15 + $0x18] sm:$0xff]  ;;  %v741_v34 = vld [vmem:[%s1446_s15 + $0x28] sm:$0xff]  ;;  %v742_v36 = vld [vmem:[%s1446_s15 + $0x30] sm:$0xff] }
  0x33   : > { %1207 = vmatprep.subr.bf16.mxu0 %v1206_v15  ;;  %v1210_v32 = vpack.c.bf16 %v739_v31, %v738_v30  ;;  %v1214_v35 = vpack.c.bf16 %v741_v34, %v740_v33  ;;  %v743_v37 = vld [vmem:[%s1446_s15 + $0x38] sm:$0xff]  ;;  %v744_v39 = vld [vmem:[%s1446_s15 + $0x40] sm:$0xff]  ;;  %v745_v40 = vld [vmem:[%s1446_s15 + $0x48] sm:$0xff] }
  0x34   : > { %v1218_v38 = vpack.c.bf16 %v743_v37, %v742_v36  ;;  %v1222_v41 = vpack.c.bf16 %v745_v40, %v744_v39  ;;  %v746_v42 = vld [vmem:[%s1446_s15 + $0x50] sm:$0xff]  ;;  %v747_v43 = vld [vmem:[%s1446_s15 + $0x58] sm:$0xff]  ;;  %v748_v45 = vld [vmem:[%s1446_s15 + $0x60] sm:$0xff] }
  0x35   : > { %1119 = vmatmul.mubr.msk.f32.vlgmr.msra.gmra.mrb[0].mxu0 %vm382_vm1, %v357_v14  ;;  %1239 = vmatprep.subr.bf16.mxu1 %v1210_v32  ;;  %v1226_v44 = vpack.c.bf16 %v747_v43, %v746_v42  ;;  %v749_v46 = vld [vmem:[%s1446_s15 + $0x68] sm:$0xff]  ;;  %v750_v48 = vld [vmem:[%s1446_s15 + $0x70] sm:$0xff]  ;;  %v751_v49 = vld [vmem:[%s1446_s15 + $0x78] sm:$0xff] }
  0x36   : > { %1121 = vmatprep.mubr.msk.f32.mxu0 %vm382_vm1, %v358_v16  ;;  %1209 = vmatpush3.bf16.msra.mxu0 %v1206_v15  ;;  %v1230_v47 = vpack.c.bf16 %v749_v46, %v748_v45  ;;  %v1234_v50 = vpack.c.bf16 %v751_v49, %v750_v48  ;;  %v1600_v51 = vld [vmem:[%s376_s13] ss:$0 sm:$0xff] }
  0x37   : > { %1211 = vmatprep.subr.bf16.mxu0 %v1210_v32  ;;  %1247 = vmatpush3.bf16.msra.mxu1 %v1210_v32 }
  0x38   : > { %1240 = vmatprep.subr.bf16.mxu1 %v1214_v35 }
  0x39   : > { %1122 = vmatmul.mubr.msk.f32.gmra.mrb[2].mxu0 %vm382_vm1, %v359_v17 }
  0x3a   : > { %1124 = vmatprep.mubr.msk.f32.mxu0 %vm382_vm1, %v360_v18  ;;  %1213 = vmatpush3.bf16.msra.mxu0 %v1210_v32 }
  0x3b   : > { %1215 = vmatprep.subr.bf16.mxu0 %v1214_v35  ;;  %1248 = vmatpush3.bf16.msra.mxu1 %v1214_v35 }
  0x3c   : > { %1241 = vmatprep.subr.bf16.mxu1 %v1218_v38 }
  0x3d   : > { %1125 = vmatmul.mubr.msk.f32.gmra.mrb[4].mxu0 %vm382_vm1, %v361_v19 }
  0x3e   : > { %1127 = vmatprep.mubr.msk.f32.mxu0 %vm382_vm1, %v362_v20  ;;  %1217 = vmatpush3.bf16.msra.mxu0 %v1214_v35 }
  0x3f   : > { %1219 = vmatprep.subr.bf16.mxu0 %v1218_v38  ;;  %1249 = vmatpush3.bf16.msra.mxu1 %v1218_v38 }
  0x40   : > { %1242 = vmatprep.subr.bf16.mxu1 %v1222_v41 }
  0x41   : > { %1128 = vmatmul.mubr.msk.f32.gmra.mrb[6].mxu0 %vm382_vm1, %v363_v21 }
  0x42   : > { %1130 = vmatprep.mubr.msk.f32.mxu0 %vm382_vm1, %v364_v22  ;;  %1221 = vmatpush3.bf16.msra.mxu0 %v1218_v38 }
  0x43   : > { %1223 = vmatprep.subr.bf16.mxu0 %v1222_v41  ;;  %1250 = vmatpush3.bf16.msra.mxu1 %v1222_v41 }
  0x44   : > { %1243 = vmatprep.subr.bf16.mxu1 %v1226_v44 }
  0x45   : > { %1131 = vmatmul.mubr.msk.f32.gmra.mrb[8].mxu0 %vm382_vm1, %v365_v23 }
  0x46   : > { %1133 = vmatprep.mubr.msk.f32.mxu0 %vm382_vm1, %v366_v24  ;;  %1225 = vmatpush3.bf16.msra.mxu0 %v1222_v41 }
  0x47   : > { %1227 = vmatprep.subr.bf16.mxu0 %v1226_v44  ;;  %1251 = vmatpush3.bf16.msra.mxu1 %v1226_v44 }
  0x48   : > { %1244 = vmatprep.subr.bf16.mxu1 %v1230_v47 }
  0x49   : > { %1134 = vmatmul.mubr.msk.f32.gmra.mrb[10].mxu0 %vm382_vm1, %v367_v25 }
  0x4a   : > { %1136 = vmatprep.mubr.msk.f32.mxu0 %vm382_vm1, %v368_v26  ;;  %1229 = vmatpush3.bf16.msra.mxu0 %v1226_v44 }
  0x4b   : > { %1231 = vmatprep.subr.bf16.mxu0 %v1230_v47  ;;  %1252 = vmatpush3.bf16.msra.mxu1 %v1230_v47 }
  0x4c   : > { %1245 = vmatprep.subr.bf16.mxu1 %v1234_v50 }
  0x4d   : > { %1137 = vmatmul.mubr.msk.f32.gmra.mrb[12].mxu0 %vm382_vm1, %v369_v27 }
  0x4e   : > { %1139 = vmatprep.mubr.msk.f32.mxu0 %vm382_vm1, %v370_v28  ;;  %1233 = vmatpush3.bf16.msra.mxu0 %v1230_v47 }
  0x4f   : > { %1235 = vmatprep.subr.bf16.mxu0 %v1234_v50  ;;  %1253 = vmatpush3.bf16.msra.mxu1 %v1234_v50 }
  0x51   : > { %1140 = vmatmul.mubr.msk.f32.gmra.mrb[14].mxu0 %vm382_vm1, %v371_v29 }
  0x52   : > { %1237 = vmatpush3.bf16.msra.mxu0 %v1234_v50 }
 0x108   : > { %v1120_v52 = vpop.f32.mrb[0].mxu0 }
 0x109   : > { %v503_v53 = vadd.f32 %v1120_v52, %v1600_v51  ;;  %v497_v54 = vpop.f32.mrb[1].mxu0 }
 0x10a   : > { %v498_v55 = vadd.f32 %v1600_v51, %v497_v54 }
 0x10b   : > { %v593_v56 = vmul.f32 0.044715, %v503_v53  ;;  %v577_v40 = vmul.f32 0.5, %v503_v53 }
 0x10c   : > { %v592_v57 = vmul.f32 0.044715, %v498_v55  ;;  %v1123_v58 = vpop.f32.mrb[2].mxu0  ;;  %v576_v46 = vmul.f32 0.5, %v498_v55 }
 0x10d   : > { %v609_v59 = vmul.f32 %v593_v56, %v503_v53  ;;  %v1605_v60 = vadd.f32 %v1123_v58, %v1600_v51  ;;  %v507_v61 = vpop.f32.mrb[3].mxu0 }
 0x10e   : > { %v608_v62 = vmul.f32 %v592_v57, %v498_v55  ;;  %v1608_v63 = vadd.f32 %v1600_v51, %v507_v61 }
 0x10f   : > { %v625_v0 = vmul.f32 %v609_v59, %v503_v53  ;;  %v595_v1 = vmul.f32 0.044715, %v1605_v60  ;;  %v579_v59 = vmul.f32 0.5, %v1605_v60 }
 0x110   : > { %v594_v2 = vmul.f32 0.044715, %v1608_v63  ;;  %v1126_v3 = vpop.f32.mrb[4].mxu0  ;;  %v624_v4 = vmul.f32 %v608_v62, %v498_v55 }
 0x111   : > { %v641_v5 = vadd.f32 %v625_v0, %v503_v53  ;;  %v611_v6 = vmul.f32 %v595_v1, %v1605_v60  ;;  %v1614_v7 = vadd.f32 %v1126_v3, %v1600_v51  ;;  %v517_v8 = vpop.f32.mrb[5].mxu0 }
 0x112   : > { %v610_v9 = vmul.f32 %v594_v2, %v1608_v63  ;;  %v1618_v10 = vadd.f32 %v1600_v51, %v517_v8  ;;  %v640_v11 = vadd.f32 %v624_v4, %v498_v55 }
 0x113   : > { %v657_v12 = vmul.f32 0.7978846, %v641_v5  ;;  %v597_v13 = vmul.f32 0.044715, %v1614_v7  ;;  %v627_v14 = vmul.f32 %v611_v6, %v1605_v60 }
 0x114   : > { %v596_v15 = vmul.f32 0.044715, %v1618_v10  ;;  %v1129_v16 = vpop.f32.mrb[6].mxu0  ;;  %v656_v17 = vmul.f32 0.7978846, %v640_v11  ;;  %v626_v18 = vmul.f32 %v610_v9, %v1608_v63  ;;  %v578_v11 = vmul.f32 0.5, %v1608_v63 }
 0x115   : > { %1294 = vtanh.f32 %v657_v12  ;;  %v613_v19 = vmul.f32 %v597_v13, %v1614_v7  ;;  %v1626_v20 = vadd.f32 %v1129_v16, %v1600_v51  ;;  %v527_v21 = vpop.f32.mrb[7].mxu0  ;;  %v643_v22 = vadd.f32 %v627_v14, %v1605_v60 }
 0x116   : > { %v612_v23 = vmul.f32 %v596_v15, %v1618_v10  ;;  %v1631_v24 = vadd.f32 %v1600_v51, %v527_v21  ;;  %1296 = vtanh.f32 %v656_v17  ;;  %v642_v25 = vadd.f32 %v626_v18, %v1608_v63 }
 0x117   : > { %v599_v26 = vmul.f32 0.044715, %v1626_v20  ;;  %v659_v27 = vmul.f32 0.7978846, %v643_v22  ;;  %v629_v28 = vmul.f32 %v613_v19, %v1614_v7 }
 0x118   : > { %v1132_v29 = vpop.f32.mrb[8].mxu0  ;;  %v658_v30 = vmul.f32 0.7978846, %v642_v25  ;;  %v628_v31 = vmul.f32 %v612_v23, %v1618_v10  ;;  %v598_v32 = vmul.f32 0.044715, %v1631_v24 }
 0x119   : > { %v615_v33 = vmul.f32 %v599_v26, %v1626_v20  ;;  %v1640_v34 = vadd.f32 %v1132_v29, %v1600_v51  ;;  %v537_v35 = vpop.f32.mrb[9].mxu0  ;;  %1298 = vtanh.f32 %v659_v27  ;;  %v645_v36 = vadd.f32 %v629_v28, %v1614_v7 }
 0x11a   : > { %v1644_v37 = vadd.f32 %v1600_v51, %v537_v35  ;;  %1300 = vtanh.f32 %v658_v30  ;;  %v644_v38 = vadd.f32 %v628_v31, %v1618_v10  ;;  %v614_v39 = vmul.f32 %v598_v32, %v1631_v24 }
 0x11b   : > { %v601_v41 = vmul.f32 0.044715, %v1640_v34  ;;  %v661_v42 = vmul.f32 0.7978846, %v645_v36  ;;  %v631_v43 = vmul.f32 %v615_v33, %v1626_v20 }
 0x11c   : > { %v600_v44 = vmul.f32 0.044715, %v1644_v37  ;;  %v1135_v45 = vpop.f32.mrb[10].mxu0  ;;  %v660_v47 = vmul.f32 0.7978846, %v644_v38  ;;  %v630_v48 = vmul.f32 %v614_v39, %v1631_v24 }
 0x11d   : > { %v617_v49 = vmul.f32 %v601_v41, %v1640_v34  ;;  %v1654_v50 = vadd.f32 %v1135_v45, %v1600_v51  ;;  %v547_v52 = vpop.f32.mrb[11].mxu0  ;;  %1302 = vtanh.f32 %v661_v42  ;;  %v647_v53 = vadd.f32 %v631_v43, %v1626_v20 }
 0x11e   : > { %v616_v54 = vmul.f32 %v600_v44, %v1644_v37  ;;  %v1659_v56 = vadd.f32 %v1600_v51, %v547_v52  ;;  %1304 = vtanh.f32 %v660_v47  ;;  %v646_v55 = vadd.f32 %v630_v48, %v1631_v24 }
 0x11f   : > { %v1295_v57 = vpop.eup %1294  ;;  %v603_v58 = vmul.f32 0.044715, %v1654_v50  ;;  %v663_v61 = vmul.f32 0.7978846, %v647_v53  ;;  %v633_v62 = vmul.f32 %v617_v49, %v1640_v34 }
 0x120   : > { %v1297_v0 = vpop.eup %1296  ;;  %v602_v1 = vmul.f32 0.044715, %v1659_v56  ;;  %v1138_v2 = vpop.f32.mrb[12].mxu0  ;;  %v689_v3 = vadd.f32 1.0, %v1295_v57  ;;  %v662_v4 = vmul.f32 0.7978846, %v646_v55  ;;  %v632_v5 = vmul.f32 %v616_v54, %v1644_v37 }
 0x121   : > { %v1668_v6 = vadd.f32 %v1138_v2, %v1600_v51  ;;  %v557_v8 = vpop.f32.mrb[13].mxu0  ;;  %v688_v9 = vadd.f32 1.0, %v1297_v0  ;;  %1306 = vtanh.f32 %v663_v61  ;;  %v619_v60 = vmul.f32 %v603_v58, %v1654_v50 }
 0x122   : > { %v618_v12 = vmul.f32 %v602_v1, %v1659_v56  ;;  %v1674_v13 = vadd.f32 %v1600_v51, %v557_v8  ;;  %1308 = vtanh.f32 %v662_v4  ;;  %v648_v17 = vadd.f32 %v632_v5, %v1644_v37 }
 0x123   : > { %v1299_v14 = vpop.eup %1298  ;;  %v605_v15 = vmul.f32 0.044715, %v1668_v6  ;;  %v704_v16 = vmul.f32 %v688_v9, %v576_v46  ;;  %v649_v18 = vadd.f32 %v633_v62, %v1640_v34  ;;  %v705_v22 = vmul.f32 %v689_v3, %v577_v40 }
 0x124   : > { %v1301_v19 = vpop.eup %1300  ;;  %v604_v63 = vmul.f32 0.044715, %v1674_v13  ;;  %v1141_v21 = vpop.f32.mrb[14].mxu0  ;;  %v691_v23 = vadd.f32 1.0, %v1299_v14  ;;  %v634_v25 = vmul.f32 %v618_v12, %v1659_v56  ;;  %v664_v30 = vmul.f32 0.7978846, %v648_v17 }
 0x125   : > { %v621_v26 = vmul.f32 %v605_v15, %v1668_v6  ;;  %v1683_v27 = vadd.f32 %v1141_v21, %v1600_v51  ;;  %v567_v28 = vpop.f32.mrb[15].mxu0  ;;  %1174 = vmatprep.mubr.f32.mxu0 %v704_v16  ;;  %v690_v29 = vadd.f32 1.0, %v1301_v19  ;;  %v665_v35 = vmul.f32 0.7978846, %v649_v18 }
 0x126   : > { %v620_v31 = vmul.f32 %v604_v63, %v1674_v13  ;;  %v1687_v32 = vadd.f32 %v1600_v51, %v567_v28  ;;  %1175 = vmatmul.mubr.f32.vlgmr.msra.gmra.mrb[16].mxu0 %v705_v22  ;;  %v707_v33 = vmul.f32 %v691_v23, %v579_v59  ;;  %1310 = vtanh.f32 %v664_v30 }
 0x127   : > { %v1303_v36 = vpop.eup %1302  ;;  %v607_v38 = vmul.f32 0.044715, %v1683_v27  ;;  %v706_v39 = vmul.f32 %v690_v29, %v578_v11  ;;  %v650_v40 = vadd.f32 %v634_v25, %v1659_v56  ;;  %1312 = vtanh.f32 %v665_v35 }
 0x128   : > { %v1305_v41 = vpop.eup %1304  ;;  %v606_v42 = vmul.f32 0.044715, %v1687_v32  ;;  %v693_v43 = vadd.f32 1.0, %v1303_v36  ;;  %v635_v44 = vmul.f32 %v619_v60, %v1654_v50  ;;  %v580_v51 = vmul.f32 0.5, %v1618_v10 }
 0x129   : > { %1177 = vmatprep.mubr.f32.mxu0 %v706_v39  ;;  %v692_v45 = vadd.f32 1.0, %v1305_v41  ;;  %v581_v46 = vmul.f32 0.5, %v1614_v7  ;;  %v666_v47 = vmul.f32 0.7978846, %v650_v40  ;;  %v623_v48 = vmul.f32 %v607_v38, %v1683_v27 }
 0x12a   : > { %v622_v49 = vmul.f32 %v606_v42, %v1687_v32  ;;  %1178 = vmatmul.mubr.f32.gmra.mrb[18].mxu0 %v707_v33  ;;  %v651_v52 = vadd.f32 %v635_v44, %v1654_v50  ;;  %v636_v53 = vmul.f32 %v620_v31, %v1674_v13  ;;  %v637_v57 = vmul.f32 %v621_v26, %v1668_v6 }
 0x12b   : > { %v1307_v54 = vpop.eup %1306  ;;  %v708_v55 = vmul.f32 %v692_v45, %v580_v51  ;;  %1314 = vtanh.f32 %v666_v47  ;;  %v709_v10 = vmul.f32 %v693_v43, %v581_v46  ;;  %v582_v62 = vmul.f32 0.5, %v1631_v24  ;;  %v721_v45 = vld [vmem:[%s1848_s5 + $0x8] sm:$0xff] }
 0x12c   : > { %v1309_v58 = vpop.eup %1308  ;;  %v695_v59 = vadd.f32 1.0, %v1307_v54  ;;  %v667_v61 = vmul.f32 0.7978846, %v651_v52  ;;  %v652_v7 = vadd.f32 %v636_v53, %v1674_v13  ;;  %v653_v1 = vadd.f32 %v637_v57, %v1668_v6  ;;  %v725_v57 = vld [vmem:[%s1848_s5 + $0x28] sm:$0xff] }
 0x12d   : > { %1180 = vmatprep.mubr.f32.mxu0 %v708_v55  ;;  %v694_v0 = vadd.f32 1.0, %v1309_v58  ;;  %v638_v2 = vmul.f32 %v622_v49, %v1687_v32  ;;  %v583_v3 = vmul.f32 0.5, %v1626_v20  ;;  %v639_v5 = vmul.f32 %v623_v48, %v1683_v27  ;;  %v723_v49 = vld [vmem:[%s1848_s5 + $0x18] sm:$0xff]  ;;  %v724_v58 = vld [vmem:[%s1848_s5 + $0x20] sm:$0xff] }
 0x12e   : > { %1181 = vmatmul.mubr.f32.gmra.mrb[20].mxu0 %v709_v10  ;;  %1316 = vtanh.f32 %v667_v61  ;;  %v668_v4 = vmul.f32 0.7978846, %v652_v7  ;;  %v669_v9 = vmul.f32 0.7978846, %v653_v1  ;;  %v584_v20 = vmul.f32 0.5, %v1644_v37 }
 0x12f   : > { %v710_v8 = vmul.f32 %v694_v0, %v582_v62  ;;  %v654_v11 = vadd.f32 %v638_v2, %v1687_v32  ;;  %v711_v60 = vmul.f32 %v695_v59, %v583_v3  ;;  %v655_v24 = vadd.f32 %v639_v5, %v1683_v27  ;;  %v727_v62 = vld [vmem:[%s1848_s5 + $0x38] sm:$0xff]  ;;  %v726_v0 = vld [vmem:[%s1848_s5 + $0x30] sm:$0xff]  ;;  %v729_v5 = vld [vmem:[%s1848_s5 + $0x48] sm:$0xff] }
 0x130   : > { %1318 = vtanh.f32 %v668_v4  ;;  %v1311_v12 = vpop.eup %1310  ;;  %v585_v18 = vmul.f32 0.5, %v1640_v34  ;;  %v586_v23 = vmul.f32 0.5, %v1659_v56  ;;  %v587_v29 = vmul.f32 0.5, %v1654_v50 }
 0x131   : > { %1183 = vmatprep.mubr.f32.mxu1 %v710_v8  ;;  %1320 = vtanh.f32 %v669_v9  ;;  %v670_v14 = vmul.f32 0.7978846, %v654_v11  ;;  %v1313_v15 = vpop.eup %1312  ;;  %v696_v16 = vadd.f32 1.0, %v1311_v12  ;;  %v671_v17 = vmul.f32 0.7978846, %v655_v24  ;;  %v728_v8 = vld [vmem:[%s1848_s5 + $0x40] sm:$0xff] }
 0x132   : > { %1184 = vmatmul.mubr.f32.vlgmr.msra.gmra.mrb[0].mxu1 %v711_v60  ;;  %v697_v19 = vadd.f32 1.0, %v1313_v15  ;;  %v588_v33 = vmul.f32 0.5, %v1674_v13  ;;  %v589_v56 = vmul.f32 0.5, %v1668_v6  ;;  %v590_v41 = vmul.f32 0.5, %v1687_v32  ;;  %v720_v6 = vld [vmem:[%s1848_s5] sm:$0xff]  ;;  %v731_v12 = vld [vmem:[%s1848_s5 + $0x58] sm:$0xff] }
 0x133   : > { %1322 = vtanh.f32 %v670_v14  ;;  %v712_v63 = vmul.f32 %v696_v16, %v584_v20  ;;  %v591_v51 = vmul.f32 0.5, %v1683_v27  ;;  %v722_v27 = vld [vmem:[%s1848_s5 + $0x10] sm:$0xff] }
 0x134   : > { %1324 = vtanh.f32 %v671_v17  ;;  %v713_v22 = vmul.f32 %v697_v19, %v585_v18  ;;  %v730_v14 = vld [vmem:[%s1848_s5 + $0x50] sm:$0xff]  ;;  %v733_v18 = vld [vmem:[%s1848_s5 + $0x68] sm:$0xff]  ;;  %v732_v19 = vld [vmem:[%s1848_s5 + $0x60] sm:$0xff] }
 0x135   : > { %v1315_v21 = vpop.eup %1314  ;;  %1186 = vmatprep.mubr.f32.mxu1 %v712_v63 }
 0x136   : > { %v698_v25 = vadd.f32 1.0, %v1315_v21  ;;  %1187 = vmatmul.mubr.f32.gmra.mrb[2].mxu1 %v713_v22 }
 0x138   : > { %v1317_v26 = vpop.eup %1316  ;;  %v714_v28 = vmul.f32 %v698_v25, %v586_v23  ;;  %v735_v25 = vld [vmem:[%s1848_s5 + $0x78] sm:$0xff] }
 0x139   : > { %v699_v37 = vadd.f32 1.0, %v1317_v26  ;;  %v734_v26 = vld [vmem:[%s1848_s5 + $0x70] sm:$0xff] }
 0x13a   : > { %v1319_v30 = vpop.eup %1318  ;;  %1189 = vmatprep.mubr.f32.mxu1 %v714_v28 }
 0x13b   : > { %v1321_v31 = vpop.eup %1320  ;;  %v715_v34 = vmul.f32 %v699_v37, %v587_v29  ;;  %v700_v35 = vadd.f32 1.0, %v1319_v30 }
 0x13c   : > { %v701_v36 = vadd.f32 1.0, %v1321_v31 }
 0x13d   : > { %v1323_v38 = vpop.eup %1322  ;;  %1190 = vmatmul.mubr.f32.gmra.mrb[4].mxu1 %v715_v34  ;;  %v716_v39 = vmul.f32 %v700_v35, %v588_v33 }
 0x13e   : > { %v1325_v40 = vpop.eup %1324  ;;  %v702_v42 = vadd.f32 1.0, %v1323_v38  ;;  %v717_v50 = vmul.f32 %v701_v36, %v589_v56 }
 0x13f   : > { %1192 = vmatprep.mubr.f32.mxu1 %v716_v39  ;;  %v703_v43 = vadd.f32 1.0, %v1325_v40 }
 0x140   : > { %v718_v44 = vmul.f32 %v702_v42, %v590_v41 }
 0x141   : > { %1193 = vmatmul.mubr.f32.gmra.mrb[6].mxu1 %v717_v50  ;;  %v719_v13 = vmul.f32 %v703_v43, %v591_v51 }
 0x142   : > { %1195 = vmatprep.mubr.f32.mxu1 %v718_v44 }
 0x145   : > { %1196 = vmatmul.mubr.f32.gmra.mrb[8].mxu1 %v719_v13 }
 0x1f9   : > { %v1176_v32 = vpop.f32.mrb[16].mxu0 }
 0x1fa   : > { %v898_v46 = vadd.f32 %v1176_v32, %v721_v45  ;;  %v818_v47 = vpop.f32.mrb[17].mxu0 }
 0x1fb   : > { %v897_v48 = vadd.f32 %v818_v47, %v720_v6 }
 0x1fc   : > { %914 = vst.msk [vmem:[%s1848_s5 + $0x8] sm:$0xff] %vm382_vm1, %v898_v46 }
 0x1fd   : > { %913 = vst.msk [vmem:[%s1848_s5] sm:$0xff] %vm382_vm1, %v897_v48  ;;  %v1179_v52 = vpop.f32.mrb[18].mxu0 }
 0x1fe   : > { %v900_v53 = vadd.f32 %v1179_v52, %v723_v49  ;;  %v828_v54 = vpop.f32.mrb[19].mxu0 }
 0x1ff   : > { %v899_v55 = vadd.f32 %v828_v54, %v722_v27 }
 0x200   : > { %916 = vst.msk [vmem:[%s1848_s5 + $0x18] sm:$0xff] %vm382_vm1, %v900_v53 }
 0x201   : > { %915 = vst.msk [vmem:[%s1848_s5 + $0x10] sm:$0xff] %vm382_vm1, %v899_v55  ;;  %v1182_v10 = vpop.f32.mrb[20].mxu0 }
 0x202   : > { %v902_v59 = vadd.f32 %v1182_v10, %v725_v57  ;;  %v838_v61 = vpop.f32.mrb[21].mxu0 }
 0x203   : > { %v901_v7 = vadd.f32 %v838_v61, %v724_v58 }
 0x204   : > { %918 = vst.msk [vmem:[%s1848_s5 + $0x28] sm:$0xff] %vm382_vm1, %v902_v59 }
 0x205   : > { %917 = vst.msk [vmem:[%s1848_s5 + $0x20] sm:$0xff] %vm382_vm1, %v901_v7  ;;  %v1185_v1 = vpop.f32.mrb[0].mxu1 }
 0x206   : > { %v904_v2 = vadd.f32 %v1185_v1, %v727_v62  ;;  %v848_v3 = vpop.f32.mrb[1].mxu1 }
 0x207   : > { %v903_v4 = vadd.f32 %v848_v3, %v726_v0 }
 0x208   : > { %920 = vst.msk [vmem:[%s1848_s5 + $0x38] sm:$0xff] %vm382_vm1, %v904_v2 }
 0x209   : > { %919 = vst.msk [vmem:[%s1848_s5 + $0x30] sm:$0xff] %vm382_vm1, %v903_v4  ;;  %v1188_v9 = vpop.f32.mrb[2].mxu1 }
 0x20a   : > { %v906_v11 = vadd.f32 %v1188_v9, %v729_v5  ;;  %v858_v60 = vpop.f32.mrb[3].mxu1 }
 0x20b   : > { %v905_v24 = vadd.f32 %v858_v60, %v728_v8 }
 0x20c   : > { %922 = vst.msk [vmem:[%s1848_s5 + $0x48] sm:$0xff] %vm382_vm1, %v906_v11 }
 0x20d   : > { %921 = vst.msk [vmem:[%s1848_s5 + $0x40] sm:$0xff] %vm382_vm1, %v905_v24 }
 0x210   : > { %v1191_v15 = vpop.f32.mrb[4].mxu1 }
 0x211   : > { %v908_v20 = vadd.f32 %v1191_v15, %v731_v12  ;;  %v868_v16 = vpop.f32.mrb[5].mxu1 }
 0x212   : > { %v907_v17 = vadd.f32 %v868_v16, %v730_v14 }
 0x213   : > { %924 = vst.msk [vmem:[%s1848_s5 + $0x58] sm:$0xff] %vm382_vm1, %v908_v20 }
 0x214   : > { %923 = vst.msk [vmem:[%s1848_s5 + $0x50] sm:$0xff] %vm382_vm1, %v907_v17  ;;  %v1194_v63 = vpop.f32.mrb[6].mxu1 }
 0x215   : > { %v910_v21 = vadd.f32 %v1194_v63, %v733_v18  ;;  %v878_v22 = vpop.f32.mrb[7].mxu1 }
 0x216   : > { %v909_v23 = vadd.f32 %v878_v22, %v732_v19 }
 0x217   : > { %926 = vst.msk [vmem:[%s1848_s5 + $0x68] sm:$0xff] %vm382_vm1, %v910_v21 }
 0x218   : > { %925 = vst.msk [vmem:[%s1848_s5 + $0x60] sm:$0xff] %vm382_vm1, %v909_v23  ;;  %v1197_v28 = vpop.f32.mrb[8].mxu1 }
 0x219   : > { %v912_v29 = vadd.f32 %v1197_v28, %v735_v25  ;;  %v888_v37 = vpop.f32.mrb[9].mxu1 }
 0x21a   : > { %v911_v30 = vadd.f32 %v888_v37, %v734_v26 }
 0x21b   : > { %928 = vst.msk [vmem:[%s1848_s5 + $0x78] sm:$0xff] %vm382_vm1, %v912_v29 }
 0x21c   : > { %927 = vst.msk [vmem:[%s1848_s5 + $0x70] sm:$0xff] %vm382_vm1, %v911_v30 }
 0x21d PF: > { %s15_s22 = sadd.s32 1, %s1364_s22   ;;  %s1849_s18 = smov %s1352_s19 }
 0x21e   : > { %p12_p11 = scmp.ge.s32.totalorder %s15_s22, 4   ;;  %s1850_s19 = smov %s1431_s26 }
 0x21f   : > { %s1851_s20 = smov %s1360_s21  ;;  %s1852_s21 = smov %s1854_s23 }
 0x220   :  { %14 = sbr.rel (!%p12_p11) target bundleno = 3 (0x3), region = 124 }

</bundles_post_ra>
